<compile_context>
chip_gen: v6e
topology: v6e:2x2x1
jax: 0.10.0
libtpu: 0.0.40
codegen_flags: <defaults>
</compile_context>

<pallas_src>
import jax
import jax.numpy as jnp
from jax.experimental import pallas as pl
from jax.experimental.pallas import tpu as pltpu


# Budget for the pipelined (double-buffered) block buffers.
_VMEM_BUDGET_BYTES = 16 * 1024 * 1024
# Explicit scoped-VMEM limit: above v5e's 16 MiB default, comfortably under
# v7x's 64 MiB physical per-TensorCore capacity.
_VMEM_LIMIT_BYTES = 32 * 1024 * 1024


def _round_up(x, m):
    return (x + m - 1) // m * m


# ----------------------------------------------------------------------------
# Glue: exact replica of the ROIAlign CUDA bilinear_interpolate() weight logic,
# expressed as a (separable) dense interpolation matrix per ROI.  Kept in f32.
# ----------------------------------------------------------------------------
def _bilinear_weights_1d(coord, size):
    """1-D bilinear weights over a grid of `size` pixels for sample coords."""
    coord = coord.astype(jnp.float32)
    oob = (coord < -1.0) | (coord > size)
    c = jnp.maximum(coord, 0.0)
    low = jnp.floor(c).astype(jnp.int32)
    over = low >= size - 1
    low = jnp.where(over, size - 1, low)
    high = jnp.where(over, size - 1, low + 1)
    c = jnp.where(over, low.astype(jnp.float32), c)
    l = c - low.astype(jnp.float32)
    h = 1.0 - l
    idx = jnp.arange(size)
    w = (h[..., None] * (idx == low[..., None]).astype(jnp.float32)
         + l[..., None] * (idx == high[..., None]).astype(jnp.float32))
    return jnp.where(oob[..., None], 0.0, w)


def _make_roi_weight_matrices(rois, H, W, pooled_h, pooled_w,
                              spatial_scale, sampling_ratio):
    """rois: [R, 5] = (batch_idx, x1, y1, x2, y2).  Returns [R, P, H*W] f32."""
    S = int(sampling_ratio)
    # TODO(synk): adaptive sampling (sampling_ratio <= 0) not implemented; the
    # AlphAction Pooler3d always passes an explicit positive sampling_ratio.
    assert S > 0, "sampling_ratio must be positive (AlphAction ROIAlign3d)"

    def one(roi):
        x1 = roi[1] * spatial_scale
        y1 = roi[2] * spatial_scale
        x2 = roi[3] * spatial_scale
        y2 = roi[4] * spatial_scale
        roi_w = jnp.maximum(x2 - x1, 1.0)
        roi_h = jnp.maximum(y2 - y1, 1.0)
        bin_h = roi_h / pooled_h
        bin_w = roi_w / pooled_w
        samp = jnp.arange(S, dtype=jnp.float32)
        ph = jnp.arange(pooled_h, dtype=jnp.float32)
        pw = jnp.arange(pooled_w, dtype=jnp.float32)
        ys = y1 + ph[:, None] * bin_h + (samp[None, :] + 0.5) * bin_h / S  # [ph,S]
        xs = x1 + pw[:, None] * bin_w + (samp[None, :] + 0.5) * bin_w / S  # [pw,S]
        wy = _bilinear_weights_1d(ys, H)      # [ph, S, H]
        wx = _bilinear_weights_1d(xs, W)      # [pw, S, W]
        Sy = wy.sum(axis=1)                   # [ph, H]
        Sx = wx.sum(axis=1)                   # [pw, W]
        Wm = (Sy[:, None, :, None] * Sx[None, :, None, :]) / float(S * S)
        return Wm.reshape(pooled_h * pooled_w, H * W)

    return jax.vmap(one)(rois.astype(jnp.float32))


# ----------------------------------------------------------------------------
# Pallas kernel: per (image, row-chunk) step, out = feats_rows @ WmT on the MXU.
# ----------------------------------------------------------------------------
def _roi_align_matmul_kernel(f_ref, w_ref, o_ref):
    # f_ref: (1, tm, HW)  x.dtype   -- streamed once per image
    # w_ref: (1, HW, GP)  x.dtype   -- VMEM-resident across the inner grid axis
    # o_ref: (1, tm, GP)  x.dtype
    o_ref[0] = jnp.dot(f_ref[0], w_ref[0],
                       preferred_element_type=jnp.float32).astype(o_ref.dtype)


def roi_align_3d(x, rois, rois_per_image, output_size, spatial_scale,
                 sampling_ratio):
    """ROIAlign3d.

    x:    [N, C, T, H, W]
    rois: [R, 5] float32 (batch_idx, x1, y1, x2, y2), ordered image-by-image
          (non-decreasing batch index), consistent with `rois_per_image`.
    rois_per_image: static tuple of per-image ROI counts summing to R.
    Returns [R, C, T, pooled_h, pooled_w] in x.dtype.
    """
    if isinstance(output_size, int):
        pooled_h = pooled_w = output_size
    else:
        pooled_h, pooled_w = output_size
    N, C, T, H, W = x.shape
    rois_per_image = tuple(int(r) for r in rois_per_image)
    assert len(rois_per_image) == N, "one ROI count per image is required"
    R = rois.shape[0]
    assert sum(rois_per_image) == R, "rois must be grouped image-by-image"
    P = pooled_h * pooled_w
    HW = H * W
    CT = C * T

    if R == 0:
        return jnp.zeros((0, C, T, pooled_h, pooled_w), dtype=x.dtype)

    G = max(max(rois_per_image), 1)           # static ROI slots per image
    GP = G * P

    # 1) per-ROI interpolation matrices (index math only), built in f32.
    wmat = _make_roi_weight_matrices(rois, H, W, pooled_h, pooled_w,
                                     spatial_scale, sampling_ratio)  # [R,P,HW]

    # 2) stack each image's ROIs along the matmul lane dim and transpose:
    #    WmT[n] : [HW, G*P].  Cast to x.dtype so bf16 features take the native
    #    bf16 MXU path (accumulation stays f32 inside the kernel).
    blocks = []
    off = 0
    for ri in rois_per_image:
        wi = wmat[off:off + ri]                                  # [ri, P, HW]
        if ri < G:
            wi = jnp.concatenate(
                [wi, jnp.zeros((G - ri, P, HW), wmat.dtype)], axis=0)
        blocks.append(wi)
        off += ri
    wmat_t = jnp.stack(blocks, axis=0).reshape(N, GP, HW)        # [N, GP, HW]
    wmat_t = jnp.transpose(wmat_t, (0, 2, 1)).astype(x.dtype)    # [N, HW, GP]

    # 3) feature slab: free row-major reshape -- no HBM transpose pass.
    feats = x.reshape(N, CT, HW)

    # 4) row-chunk the C*T axis against the VMEM budget (real itemsize).
    itemsize = jnp.dtype(x.dtype).itemsize
    fixed = 2 * HW * GP * itemsize            # double-buffered WmT
    per_row = 2 * (HW + GP) * itemsize        # double-buffered feats + out row
    avail = max(_VMEM_BUDGET_BYTES - fixed, per_row * 8)
    tm_cap = max(8, (avail // per_row) // 8 * 8)
    if CT <= tm_cap:
        tm = CT                               # full extent: always a legal block
    else:
        tm = 0
        d = (tm_cap // 8) * 8
        while d >= 8:                         # largest mult-of-8 divisor of CT
            if CT % d == 0:
                tm = d
                break
            d -= 8
        if tm == 0:
            tm = tm_cap                       # ragged last block (discarded rows)
    num_m = (CT + tm - 1) // tm
    CTp = num_m * tm

    cost = pl.CostEstimate(
        flops=2 * N * CTp * HW * GP,
        transcendentals=0,
        bytes_accessed=itemsize * (N * CT * HW + N * HW * GP + N * CTp * GP),
    )

    out = pl.pallas_call(
        _roi_align_matmul_kernel,
        out_shape=jax.ShapeDtypeStruct((N, CTp, GP), x.dtype),
        grid_spec=pltpu.PrefetchScalarGridSpec(
            num_scalar_prefetch=0,
            grid=(N, num_m),
            in_specs=[
                # feature rows of image n: each byte of x streamed exactly once.
                pl.BlockSpec((1, tm, HW), lambda n, m: (n, m, 0)),
                # per-image interpolation matrix: resident across the m axis
                # (block index does not change -> Pallas skips the re-DMA).
                pl.BlockSpec((1, HW, GP), lambda n, m: (n, 0, 0)),
            ],
            out_specs=pl.BlockSpec((1, tm, GP), lambda n, m: (n, m, 0)),
        ),
        compiler_params=pltpu.CompilerParams(
            dimension_semantics=("parallel", "parallel"),
            vmem_limit_bytes=_VMEM_LIMIT_BYTES),
        cost_estimate=cost,
    )(feats, wmat_t)

    # 5) [N, CTp, GP] -> [N, C, T, G, ph, pw], then gather the real ROI slots.
    out = out[:, :CT, :].reshape(N, C, T, G, pooled_h, pooled_w)
    n_idx, g_idx = [], []
    for i, ri in enumerate(rois_per_image):
        n_idx.extend([i] * ri)
        g_idx.extend(range(ri))
    n_idx = jnp.asarray(n_idx, jnp.int32)
    g_idx = jnp.asarray(g_idx, jnp.int32)
    # Non-adjacent advanced indices put the ROI axis in front: [R, C, T, ph, pw]
    return out[n_idx, :, :, g_idx]


# ----------------------------------------------------------------------------
# Pooler3d equivalent (boxes -> roi format -> ROIAlign3d)
# ----------------------------------------------------------------------------
class Pooler3d:
    def __init__(self, output_size, scale, sampling_ratio=None):
        assert sampling_ratio is not None, \
            'Sampling ratio should be specified for 3d roi align.'
        self.output_size = output_size
        self.scale = scale
        self.sampling_ratio = sampling_ratio

    def convert_to_roi_format(self, boxes):
        # ROI coordinates stay in float32 regardless of the feature dtype so
        # bf16 features do not degrade the interpolation-weight precision.
        bbox_list, ids_list, counts = [], [], []
        for i, b in enumerate(boxes):
            if b is None or b.shape[0] == 0:
                counts.append(0)
                bbox_list.append(jnp.zeros((0, 4), dtype=jnp.float32))
                ids_list.append(jnp.zeros((0, 1), dtype=jnp.float32))
            else:
                counts.append(int(b.shape[0]))
                bbox_list.append(b.astype(jnp.float32))
                ids_list.append(jnp.full((b.shape[0], 1), i, dtype=jnp.float32))
        concat_boxes = jnp.concatenate(bbox_list, axis=0)
        ids = jnp.concatenate(ids_list, axis=0)
        rois = jnp.concatenate([ids, concat_boxes], axis=1)
        return rois, tuple(counts)

    def __call__(self, x, boxes):
        rois, counts = self.convert_to_roi_format(boxes)
        return roi_align_3d(x, rois, counts, self.output_size, self.scale,
                            self.sampling_ratio)


# ----------------------------------------------------------------------------
if __name__ == "__main__":
    key = jax.random.PRNGKey(0)
    N, C, T, H, W = 2, 32, 4, 8, 8      # C*T = 128 rows per matmul tile
    pooled = 4
    scale = 0.25                        # feature map = 1/4 of image (image 32x32)
    sampling_ratio = 2

    kx, kb = jax.random.split(key)
    x = jax.random.normal(kx, (N, C, T, H, W), dtype=jnp.float32)

    # boxes per image, (x1, y1, x2, y2) in image coordinates
    boxes = [
        jnp.array([[4.0, 4.0, 20.0, 24.0],
                   [8.0, 2.0, 30.0, 14.0]], dtype=jnp.float32),
        jnp.array([[0.0, 0.0, 31.0, 31.0]], dtype=jnp.float32),
    ]

    pooler = Pooler3d(output_size=(pooled, pooled), scale=scale,
                      sampling_ratio=sampling_ratio)
    out = pooler(x, boxes)
    out = jax.block_until_ready(out)

    # sanity check the Pallas path against a plain-JAX einsum of the same
    # interpolation matrices.
    rois, _ = pooler.convert_to_roi_format(boxes)
    R = rois.shape[0]
    wmat = _make_roi_weight_matrices(rois, H, W, pooled, pooled, scale,
                                     sampling_ratio)
    feats_r = jnp.take(x, rois[:, 0].astype(jnp.int32), axis=0)        # [R,C,T,H,W]
    feats_r = jnp.transpose(feats_r, (0, 2, 3, 4, 1)).reshape(R, T, H * W, C)
    ref = jnp.einsum("rph,rthc->rtpc", wmat, feats_r)
    ref = jnp.transpose(ref.reshape(R, T, pooled, pooled, C),
                        (0, 4, 1, 2, 3))

    assert out.shape == (R, C, T, pooled, pooled), out.shape
    assert jnp.allclose(out, ref, atol=1e-4, rtol=1e-4)

    print("KERNEL_OK")
</pallas_src>

<mosaic_0001>
module attributes {stable_mosaic.version = 11 : i64} {
  func.func @_roi_align_matmul_kernel(%arg0: i32, %arg1: i32, %arg2: memref<1x128x64xf32, #tpu.memory_space<vmem>>, %arg3: memref<1x64x32xf32, #tpu.memory_space<vmem>>, %arg4: memref<1x128x32xf32, #tpu.memory_space<vmem>>) attributes {dimension_semantics = [#tpu.dimension_semantics<parallel>, #tpu.dimension_semantics<parallel>], iteration_bounds = array<i64: 2, 1>, scalar_prefetch = 0 : i64, scratch_operands = 0 : i64, tpu.core_type = #tpu.core_type<tc>, window_params = [{transform_indices = @transform_0, window_bounds = array<i64: 1, 128, 64>}, {transform_indices = @transform_1, window_bounds = array<i64: 1, 64, 32>}, {transform_indices = @transform_2, window_bounds = array<i64: 1, 128, 32>}]} {
    %c0 = arith.constant 0 : index
    %c0_0 = arith.constant 0 : index
    %c0_1 = arith.constant 0 : index
    %0 = vector.load %arg2[%c0, %c0_0, %c0_1] : memref<1x128x64xf32, #tpu.memory_space<vmem>>, vector<1x128x64xf32>
    %1 = vector.shape_cast %0 : vector<1x128x64xf32> to vector<128x64xf32>
    %c0_2 = arith.constant 0 : index
    %c0_3 = arith.constant 0 : index
    %c0_4 = arith.constant 0 : index
    %2 = vector.load %arg3[%c0_2, %c0_3, %c0_4] : memref<1x64x32xf32, #tpu.memory_space<vmem>>, vector<1x64x32xf32>
    %3 = vector.shape_cast %2 : vector<1x64x32xf32> to vector<64x32xf32>
    %cst = arith.constant dense<0.000000e+00> : vector<128x32xf32>
    %4 = tpu.matmul %1, %3, %cst {dimension_numbers = #tpu.dot_dimension_numbers<[1], [0], [0], [1], [0, 0, 1, 1], [], []>} : vector<128x64xf32>, vector<64x32xf32>, vector<128x32xf32> -> vector<128x32xf32>
    %c0_5 = arith.constant 0 : index
    %c0_6 = arith.constant 0 : index
    %c0_7 = arith.constant 0 : index
    %5 = vector.load %arg4[%c0_5, %c0_6, %c0_7] : memref<1x128x32xf32, #tpu.memory_space<vmem>>, vector<1x128x32xf32>
    %6 = vector.shape_cast %5 : vector<1x128x32xf32> to vector<128x32xf32>
    %7 = vector.shape_cast %4 : vector<128x32xf32> to vector<1x128x32xf32>
    tpu.vector_store %arg4[%c0_5, %c0_6, %c0_7], %7 {strides = array<i32>} : memref<1x128x32xf32, #tpu.memory_space<vmem>>, vector<1x128x32xf32>,
    return
  }
  func.func @transform_0(%arg0: i32, %arg1: i32) -> (i32, i32, i32) {
    %c0_i32 = arith.constant 0 : i32
    %c0_i32_0 = arith.constant 0 : i32
    return %arg0, %arg1, %c0_i32 : i32, i32, i32
  }
  func.func @transform_1(%arg0: i32, %arg1: i32) -> (i32, i32, i32) {
    %c0_i32 = arith.constant 0 : i32
    %c0_i32_0 = arith.constant 0 : i32
    %c0_i32_1 = arith.constant 0 : i32
    return %arg0, %c0_i32, %c0_i32_0 : i32, i32, i32
  }
  func.func @transform_2(%arg0: i32, %arg1: i32) -> (i32, i32, i32) {
    %c0_i32 = arith.constant 0 : i32
    %c0_i32_0 = arith.constant 0 : i32
    return %arg0, %arg1, %c0_i32 : i32, i32, i32
  }
}

</mosaic_0001>

<bundles_post_ra>
// kernel: tpu_custom_call.1
= control target key start
LH: loop header
LB: loop body
LE: loop exit
PB: predicated region body
PF: predicated region fallthrough
CT: control target
= control target key end

     0   :  { %s712_s9 = smov 0   ;;  %s714_s10 = smov 0   ;;  %s834_s0 = inlined_call_operand.vmem [shape: f32[2,128,64], index: 0, kind: input, shape index: {}]   ;;  %s835_s1 = inlined_call_operand.vmem [shape: f32[2,64,32], index: 1, kind: input, shape index: {}]   ;;  %s836_s2 = inlined_call_operand.vmem [shape: f32[2,128,32], index: 2, kind: output, shape index: {}]  }
   0x1   :  { %s716_s11 = smov 0  }
   0x2 LB: > { %s24_s12 = sadd.s32 1, %s691_s10  ;;  %p541_p0 = scmp.ge.s32.totalorder %s695_s11, 1  ;;  %s695_s11 = sphi %s716_s11, %s12_s11   ;;  %s691_s10 = sphi %s714_s10, %s838_s10   ;;  %s687_s9 = sphi %s712_s9, %s837_s9  }
   0x3   : > { %p26_p1 = scmp.ge.s32.totalorder %s24_s12, 2  ;;  %p143_p2 = scmp.lt.s32.totalorder %s695_s11, 3 }
   0x5   : > { %s840_s12 = smov (%p26_p1, %s24_s12), 0  ;;  %p144_p3 = pnand %p541_p0, %p143_p2 }
   0x6   : > { %p179_p4 = scmp.lt.s32.totalorder (!%p144_p3), %s687_s9, 1 }
   0x7   : > { %147 = sbr.rel (%p144_p3) target bundleno = 241 (0xf1), region = 28 }
   0xc   : > { %s842_s9 = smov (!%p179_p4, %s687_s9), 1  ;;  %vm227_vm0 = vcmask 523264   ;;  %vm421_vm1 = vcmask 261120  }
   0xd   : > { %s567_s13 = sshll.u32 %s842_s9, 6  ;;  %s566_s17 = sshll.u32 %s842_s9, 7 }
   0xe   : > { %s736_s16 = scalar_lea.vmem %s835_s1, %s567_s13  ;;  %s751_s20 = scalar_lea.vmem %s834_s0, %s566_s17 }
   0xf   : > { %v226_v0 = vld [vmem:[%s736_s16 + $0x38] sm:$0xff]  ;;  %v225_v1 = vld [vmem:[%s736_s16 + $0x30] sm:$0xff]  ;;  %v224_v2 = vld [vmem:[%s736_s16 + $0x28] sm:$0xff]  ;;  %s791_s23 = scalar_lea.vmem %s836_s2, %s566_s17 }
  0x10   : > { %593 = vmatprep.subr.mxu0 %v226_v0  ;;  %633 = vmatprep.subr.mxu1 %v226_v0  ;;  %v223_v3 = vld [vmem:[%s736_s16 + $0x20] sm:$0xff]  ;;  %v222_v4 = vld [vmem:[%s736_s16 + $0x18] sm:$0xff]  ;;  %v221_v5 = vld [vmem:[%s736_s16 + $0x10] sm:$0xff] }
  0x11   : > { %594 = vmatpush3.msra.mxu0 %v226_v0  ;;  %641 = vmatpush3.msra.mxu1 %v226_v0  ;;  %v220_v6 = vld [vmem:[%s736_s16 + $0x8] sm:$0xff]  ;;  %v219_v7 = vld [vmem:[%s736_s16] sm:$0xff]  ;;  %v205_v12 = vld [vmem:[%s751_s20 + $0x10] sm:$0xff] }
  0x12   : > { %595 = vmatprep.subr.mxu0 %v225_v1  ;;  %634 = vmatprep.subr.mxu1 %v225_v1  ;;  %v203_v8 = vld [vmem:[%s751_s20] sm:$0xff]  ;;  %v204_v10 = vld [vmem:[%s751_s20 + $0x8] sm:$0xff]  ;;  %v213_v13 = vld [vmem:[%s751_s20 + $0x50] sm:$0xff] }
  0x13   : > { %596 = vmatpush3.msra.mxu0 %v225_v1  ;;  %642 = vmatpush3.msra.mxu1 %v225_v1  ;;  %v211_v9 = vld [vmem:[%s751_s20 + $0x40] sm:$0xff]  ;;  %v212_v11 = vld [vmem:[%s751_s20 + $0x48] sm:$0xff]  ;;  %v206_v14 = vld [vmem:[%s751_s20 + $0x18] sm:$0xff] }
  0x14   : > { %597 = vmatprep.subr.mxu0 %v224_v2  ;;  %635 = vmatprep.subr.mxu1 %v224_v2  ;;  %v214_v15 = vld [vmem:[%s751_s20 + $0x58] sm:$0xff]  ;;  %v207_v16 = vld [vmem:[%s751_s20 + $0x20] sm:$0xff]  ;;  %v208_v18 = vld [vmem:[%s751_s20 + $0x28] sm:$0xff] }
  0x15   : > { %598 = vmatpush3.msra.mxu0 %v224_v2  ;;  %643 = vmatpush3.msra.mxu1 %v224_v2  ;;  %v215_v17 = vld [vmem:[%s751_s20 + $0x60] sm:$0xff]  ;;  %v216_v19 = vld [vmem:[%s751_s20 + $0x68] sm:$0xff]  ;;  %v209_v20 = vld [vmem:[%s751_s20 + $0x30] sm:$0xff] }
  0x16   : > { %599 = vmatprep.subr.mxu0 %v223_v3  ;;  %636 = vmatprep.subr.mxu1 %v223_v3  ;;  %v217_v21 = vld [vmem:[%s751_s20 + $0x70] sm:$0xff]  ;;  %v210_v22 = vld [vmem:[%s751_s20 + $0x38] sm:$0xff] }
  0x17   : > { %600 = vmatpush3.msra.mxu0 %v223_v3  ;;  %644 = vmatpush3.msra.mxu1 %v223_v3  ;;  %v218_v23 = vld [vmem:[%s751_s20 + $0x78] sm:$0xff] }
  0x18   : > { %601 = vmatprep.subr.mxu0 %v222_v4  ;;  %637 = vmatprep.subr.mxu1 %v222_v4 }
  0x19   : > { %602 = vmatpush3.msra.mxu0 %v222_v4  ;;  %645 = vmatpush3.msra.mxu1 %v222_v4 }
  0x1a   : > { %603 = vmatprep.subr.mxu0 %v221_v5  ;;  %638 = vmatprep.subr.mxu1 %v221_v5 }
  0x1b   : > { %604 = vmatpush3.msra.mxu0 %v221_v5  ;;  %646 = vmatpush3.msra.mxu1 %v221_v5 }
  0x1c   : > { %605 = vmatprep.subr.mxu0 %v220_v6  ;;  %639 = vmatprep.subr.mxu1 %v220_v6 }
  0x1d   : > { %606 = vmatpush3.msra.mxu0 %v220_v6  ;;  %647 = vmatpush3.msra.mxu1 %v220_v6 }
  0x1e   : > { %607 = vmatprep.subr.mxu0 %v219_v7  ;;  %640 = vmatprep.subr.mxu1 %v219_v7 }
  0x1f   : > { %608 = vmatpush3.msra.mxu0 %v219_v7  ;;  %648 = vmatpush3.msra.mxu1 %v219_v7 }
  0x20   : > { %609 = vmatprep.mubr.msk.f32.mxu0 %vm227_vm0, %v203_v8  ;;  %621 = vmatprep.mubr.msk.f32.mxu1 %vm227_vm0, %v211_v9 }
  0x21   : > { %610 = vmatmul.mubr.msk.f32.vlgmr.msra.gmra.mxu0 %vm227_vm0, %v204_v10  ;;  %622 = vmatmul.mubr.msk.f32.vlgmr.msra.gmra.mxu1 %vm227_vm0, %v212_v11 }
  0x22   : > { %612 = vmatprep.mubr.msk.f32.mxu0 %vm227_vm0, %v205_v12  ;;  %624 = vmatprep.mubr.msk.f32.mxu1 %vm227_vm0, %v213_v13 }
  0x25   : > { %613 = vmatmul.mubr.msk.f32.gmra.mxu0 %vm227_vm0, %v206_v14  ;;  %625 = vmatmul.mubr.msk.f32.gmra.mxu1 %vm227_vm0, %v214_v15 }
  0x26   : > { %615 = vmatprep.mubr.msk.f32.mxu0 %vm227_vm0, %v207_v16  ;;  %627 = vmatprep.mubr.msk.f32.mxu1 %vm227_vm0, %v215_v17 }
  0x29   : > { %616 = vmatmul.mubr.msk.f32.gmra.mxu0 %vm227_vm0, %v208_v18  ;;  %628 = vmatmul.mubr.msk.f32.gmra.mxu1 %vm227_vm0, %v216_v19 }
  0x2a   : > { %618 = vmatprep.mubr.msk.f32.mxu0 %vm227_vm0, %v209_v20  ;;  %630 = vmatprep.mubr.msk.f32.mxu1 %vm227_vm0, %v217_v21 }
  0x2d   : > { %619 = vmatmul.mubr.msk.f32.gmra.mxu0 %vm227_vm0, %v210_v22  ;;  %631 = vmatmul.mubr.msk.f32.gmra.mxu1 %vm227_vm0, %v218_v23 }
  0xe1   : > { %v611_v24 = vpop.f32.mrf.mxu0  ;;  %v623_v25 = vpop.f32.mrf.mxu1 }
  0xe2   : > { %423 = vst.msk [vmem:[%s791_s23 + $0x8] sm:$0xff] %vm421_vm1, %v611_v24  ;;  %431 = vst.msk [vmem:[%s791_s23 + $0x48] sm:$0xff] %vm421_vm1, %v623_v25 }
  0xe3   : > { %v342_v26 = vpop.f32.mrf.mxu0  ;;  %v382_v27 = vpop.f32.mrf.mxu1 }
  0xe4   : > { %422 = vst.msk [vmem:[%s791_s23] sm:$0xff] %vm421_vm1, %v342_v26  ;;  %430 = vst.msk [vmem:[%s791_s23 + $0x40] sm:$0xff] %vm421_vm1, %v382_v27 }
  0xe5   : > { %v614_v28 = vpop.f32.mrf.mxu0  ;;  %v626_v29 = vpop.f32.mrf.mxu1 }
  0xe6   : > { %425 = vst.msk [vmem:[%s791_s23 + $0x18] sm:$0xff] %vm421_vm1, %v614_v28  ;;  %433 = vst.msk [vmem:[%s791_s23 + $0x58] sm:$0xff] %vm421_vm1, %v626_v29 }
  0xe7   : > { %v352_v30 = vpop.f32.mrf.mxu0  ;;  %v392_v31 = vpop.f32.mrf.mxu1 }
  0xe8   : > { %424 = vst.msk [vmem:[%s791_s23 + $0x10] sm:$0xff] %vm421_vm1, %v352_v30  ;;  %432 = vst.msk [vmem:[%s791_s23 + $0x50] sm:$0xff] %vm421_vm1, %v392_v31 }
  0xe9   : > { %v617_v32 = vpop.f32.mrf.mxu0  ;;  %v629_v33 = vpop.f32.mrf.mxu1 }
  0xea   : > { %427 = vst.msk [vmem:[%s791_s23 + $0x28] sm:$0xff] %vm421_vm1, %v617_v32  ;;  %435 = vst.msk [vmem:[%s791_s23 + $0x68] sm:$0xff] %vm421_vm1, %v629_v33 }
  0xeb   : > { %v362_v34 = vpop.f32.mrf.mxu0  ;;  %v402_v35 = vpop.f32.mrf.mxu1 }
  0xec   : > { %426 = vst.msk [vmem:[%s791_s23 + $0x20] sm:$0xff] %vm421_vm1, %v362_v34  ;;  %434 = vst.msk [vmem:[%s791_s23 + $0x60] sm:$0xff] %vm421_vm1, %v402_v35 }
  0xed   : > { %v620_v36 = vpop.f32.mrf.mxu0  ;;  %v632_v37 = vpop.f32.mrf.mxu1 }
  0xee   : > { %429 = vst.msk [vmem:[%s791_s23 + $0x38] sm:$0xff] %vm421_vm1, %v620_v36  ;;  %437 = vst.msk [vmem:[%s791_s23 + $0x78] sm:$0xff] %vm421_vm1, %v632_v37 }
  0xef   : > { %v372_v38 = vpop.f32.mrf.mxu0  ;;  %v412_v39 = vpop.f32.mrf.mxu1 }
  0xf0   : > { %428 = vst.msk [vmem:[%s791_s23 + $0x30] sm:$0xff] %vm421_vm1, %v372_v38  ;;  %436 = vst.msk [vmem:[%s791_s23 + $0x70] sm:$0xff] %vm421_vm1, %v412_v39 }
  0xf1 PF: > { %s12_s11 = sadd.s32 1, %s695_s11   ;;  %s837_s9 = smov %s691_s10 }
  0xf2   : > { %p9_p5 = scmp.ge.s32.totalorder %s12_s11, 4   ;;  %s838_s10 = smov %s840_s12 }
  0xf4   :  { %11 = sbr.rel (!%p9_p5) target bundleno = 2 (0x2), region = 61 }

</bundles_post_ra>
